<compile_context>
chip_gen: v7x
topology: tpu7x:2x2x1
jax: 0.10.0
libtpu: 0.0.40
codegen_flags: <defaults>
</compile_context>

<pallas_src>
import jax
import jax.numpy as jnp
from jax.experimental import pallas as pl
from jax.experimental.pallas import tpu as pltpu

_TARGET_BLOCK_BYTES = 4 << 20          # ~4 MiB per block (amortize step overhead)
_MAX_BLOCK_BYTES = 6 << 20             # 4 x 6 MiB = 24 MiB double-buffered footprint
_VMEM_LIMIT_BYTES = 32 * 1024 * 1024   # safe scoped limit on v5e/v6e/v7x
_LANES = 128


def _scaling_kernel(shift_ref, inv_scale_ref, x_ref, o_ref):
    # shift_ref / inv_scale_ref: SMEM (C,) scalar-prefetch refs.
    # x_ref / o_ref: VMEM (Nb, C, Rb, 128) tile for the current grid point.
    C = x_ref.shape[1]
    for c in range(C):  # static unroll, C == 3 for LPIPS
        o_ref[:, c, :, :] = (
            (x_ref[:, c, :, :] - shift_ref[c]) * inv_scale_ref[c]
        ).astype(o_ref.dtype)


def _sublane_step(itemsize):
    # 8 rows for f32, 16 for bf16, 32 for int8/fp8 (sub-32-bit sublane packing).
    return max(8, (8 * 4) // itemsize)


def _align_down(x, m):
    return (x // m) * m


def _align_up(x, m):
    return ((x + m - 1) // m) * m


def _pick_blocks(N, C, R, itemsize):
    """Choose (Nb, Rb) for block (Nb, C, Rb, 128)."""
    step = _sublane_step(itemsize)
    row_bytes = C * _LANES * itemsize          # bytes per block-row (Nb == 1)
    rows_target = max(step, _TARGET_BLOCK_BYTES // row_bytes)
    rows_cap = max(step, _MAX_BLOCK_BYTES // row_bytes)
    rows = min(rows_target, rows_cap)

    if R <= rows:
        Rb = R                                  # whole plane fits in one block
    else:
        Rb = max(step, _align_down(rows, step)) # partial block: sublane-aligned

    Nb = 1
    if Rb == R:
        # Fold batch items into the block when a single plane is tiny.
        plane_bytes = C * R * _LANES * itemsize
        Nb = max(1, min(N, _TARGET_BLOCK_BYTES // max(plane_bytes, 1)))
        while Nb > 1 and Nb * plane_bytes > _MAX_BLOCK_BYTES:
            Nb -= 1

    # Megacore (v7x): avoid a single-step grid when we can split evenly.
    if pl.cdiv(N, Nb) * pl.cdiv(R, Rb) == 1:
        if N >= 2:
            Nb = (N + 1) // 2
        elif R > step:
            half = _align_up((R + 1) // 2, step)
            if half < R:
                Rb = half
    return Nb, Rb


def scaling_layer(x, shift, scale):
    """(x - shift[None,:,None,None]) / scale[None,:,None,None], x in NCHW."""
    N, C, H, W = x.shape
    assert shift.shape == (C,) and scale.shape == (C,)

    # Exact f32 scalar reciprocal, computed once for C (=3) elements.
    shift = shift.astype(jnp.float32)
    inv_scale = (1.0 / scale.astype(jnp.float32)).astype(jnp.float32)

    itemsize = jnp.dtype(x.dtype).itemsize
    hw = H * W
    R = pl.cdiv(hw, _LANES)
    pad = R * _LANES - hw

    # Lane-dense view: last dim exactly 128 lanes -> full-width stores.
    x_flat = x.reshape(N, C, hw)
    if pad:
        x_flat = jnp.pad(x_flat, ((0, 0), (0, 0), (0, pad)))
    x_v = x_flat.reshape(N, C, R, _LANES)

    Nb, Rb = _pick_blocks(N, C, R, itemsize)
    grid = (pl.cdiv(N, Nb), pl.cdiv(R, Rb))
    block = (Nb, C, Rb, _LANES)

    def _index_map(n, r, shift_ref, inv_scale_ref):
        del shift_ref, inv_scale_ref  # prefetch refs unused for indexing
        return (n, 0, r, 0)

    grid_spec = pltpu.PrefetchScalarGridSpec(
        num_scalar_prefetch=2,  # shift, inv_scale -> SMEM
        grid=grid,
        in_specs=[pl.BlockSpec(block, _index_map)],
        out_specs=pl.BlockSpec(block, _index_map),
    )

    out = pl.pallas_call(
        _scaling_kernel,
        out_shape=jax.ShapeDtypeStruct((N, C, R, _LANES), x.dtype),
        grid_spec=grid_spec,
        compiler_params=pltpu.CompilerParams(
            dimension_semantics=("parallel", "parallel"),
            vmem_limit_bytes=_VMEM_LIMIT_BYTES,
        ),
    )(shift, inv_scale, x_v)

    out = out.reshape(N, C, R * _LANES)
    if pad:
        out = out[:, :, :hw]
    return out.reshape(N, C, H, W)


if __name__ == "__main__":
    # Buffers fixed by the module's __init__ (C = 3).
    shift = jnp.array([-0.030, -0.088, -0.188], dtype=jnp.float32)
    scale = jnp.array([0.458, 0.448, 0.450], dtype=jnp.float32)

    key = jax.random.PRNGKey(0)

    # (1) lane-dense tiny plane with batch folding, (2) ragged H*W (padded path),
    # (3) lane-dense medium plane, (4) canonical LPIPS input (row-split grid).
    shapes = [(2, 3, 16, 16), (1, 3, 17, 19), (2, 3, 32, 32), (1, 3, 224, 224)]
    ok = True
    for i, shp in enumerate(shapes):
        k = jax.random.fold_in(key, i)
        x = jax.random.normal(k, shp, dtype=jnp.float32)
        out = jax.block_until_ready(scaling_layer(x, shift, scale))
        ref = (x - shift[None, :, None, None]) / scale[None, :, None, None]
        ok = ok and (out.shape == ref.shape) and (out.dtype == ref.dtype)
        ok = ok and bool(jnp.allclose(out, ref, rtol=1e-5, atol=1e-6))
    assert ok
    print("KERNEL_OK")
</pallas_src>

<mosaic_0001>
module attributes {stable_mosaic.version = 11 : i64} {
  func.func @_scaling_kernel(%arg0: i32, %arg1: i32, %arg2: memref<3xf32, #tpu.memory_space<smem>>, %arg3: memref<3xf32, #tpu.memory_space<smem>>, %arg4: memref<1x3x2x128xf32, #tpu.memory_space<vmem>>, %arg5: memref<1x3x2x128xf32, #tpu.memory_space<vmem>>) attributes {dimension_semantics = [#tpu.dimension_semantics<parallel>, #tpu.dimension_semantics<parallel>], iteration_bounds = array<i64: 2, 1>, scalar_prefetch = 2 : i64, scratch_operands = 0 : i64, tpu.core_type = #tpu.core_type<tc>, window_params = [{transform_indices = @transform_0, window_bounds = array<i64: 1, 3, 2, 128>}, {transform_indices = @transform_1, window_bounds = array<i64: 1, 3, 2, 128>}]} {
    %c0 = arith.constant 0 : index
    %c0_0 = arith.constant 0 : index
    %c0_1 = arith.constant 0 : index
    %c0_2 = arith.constant 0 : index
    %0 = vector.load %arg4[%c0, %c0_0, %c0_1, %c0_2] : memref<1x3x2x128xf32, #tpu.memory_space<vmem>>, vector<1x1x2x128xf32>
    %1 = vector.shape_cast %0 : vector<1x1x2x128xf32> to vector<1x2x128xf32>
    %c0_3 = arith.constant 0 : index
    %2 = memref.load %arg2[%c0_3] : memref<3xf32, #tpu.memory_space<smem>>
    %3 = vector.broadcast %2 : f32 to vector<1x2x128xf32>
    %4 = arith.subf %1, %3 : vector<1x2x128xf32>
    %c0_4 = arith.constant 0 : index
    %5 = memref.load %arg3[%c0_4] : memref<3xf32, #tpu.memory_space<smem>>
    %6 = vector.broadcast %5 : f32 to vector<1x2x128xf32>
    %7 = arith.mulf %4, %6 : vector<1x2x128xf32>
    %c0_5 = arith.constant 0 : index
    %c0_6 = arith.constant 0 : index
    %c0_7 = arith.constant 0 : index
    %c0_8 = arith.constant 0 : index
    %8 = vector.load %arg5[%c0_5, %c0_6, %c0_7, %c0_8] : memref<1x3x2x128xf32, #tpu.memory_space<vmem>>, vector<1x1x2x128xf32>
    %9 = vector.shape_cast %8 : vector<1x1x2x128xf32> to vector<1x2x128xf32>
    %10 = vector.shape_cast %7 : vector<1x2x128xf32> to vector<1x1x2x128xf32>
    tpu.vector_store %arg5[%c0_5, %c0_6, %c0_7, %c0_8], %10 {strides = array<i32>} : memref<1x3x2x128xf32, #tpu.memory_space<vmem>>, vector<1x1x2x128xf32>,
    %c0_9 = arith.constant 0 : index
    %c1 = arith.constant 1 : index
    %c0_10 = arith.constant 0 : index
    %c0_11 = arith.constant 0 : index
    %11 = vector.load %arg4[%c0_9, %c1, %c0_10, %c0_11] : memref<1x3x2x128xf32, #tpu.memory_space<vmem>>, vector<1x1x2x128xf32>
    %12 = vector.shape_cast %11 : vector<1x1x2x128xf32> to vector<1x2x128xf32>
    %c1_12 = arith.constant 1 : index
    %13 = memref.load %arg2[%c1_12] : memref<3xf32, #tpu.memory_space<smem>>
    %14 = vector.broadcast %13 : f32 to vector<1x2x128xf32>
    %15 = arith.subf %12, %14 : vector<1x2x128xf32>
    %c1_13 = arith.constant 1 : index
    %16 = memref.load %arg3[%c1_13] : memref<3xf32, #tpu.memory_space<smem>>
    %17 = vector.broadcast %16 : f32 to vector<1x2x128xf32>
    %18 = arith.mulf %15, %17 : vector<1x2x128xf32>
    %c0_14 = arith.constant 0 : index
    %c1_15 = arith.constant 1 : index
    %c0_16 = arith.constant 0 : index
    %c0_17 = arith.constant 0 : index
    %19 = vector.load %arg5[%c0_14, %c1_15, %c0_16, %c0_17] : memref<1x3x2x128xf32, #tpu.memory_space<vmem>>, vector<1x1x2x128xf32>
    %20 = vector.shape_cast %19 : vector<1x1x2x128xf32> to vector<1x2x128xf32>
    %21 = vector.shape_cast %18 : vector<1x2x128xf32> to vector<1x1x2x128xf32>
    tpu.vector_store %arg5[%c0_14, %c1_15, %c0_16, %c0_17], %21 {strides = array<i32>} : memref<1x3x2x128xf32, #tpu.memory_space<vmem>>, vector<1x1x2x128xf32>,
    %c0_18 = arith.constant 0 : index
    %c2 = arith.constant 2 : index
    %c0_19 = arith.constant 0 : index
    %c0_20 = arith.constant 0 : index
    %22 = vector.load %arg4[%c0_18, %c2, %c0_19, %c0_20] : memref<1x3x2x128xf32, #tpu.memory_space<vmem>>, vector<1x1x2x128xf32>
    %23 = vector.shape_cast %22 : vector<1x1x2x128xf32> to vector<1x2x128xf32>
    %c2_21 = arith.constant 2 : index
    %24 = memref.load %arg2[%c2_21] : memref<3xf32, #tpu.memory_space<smem>>
    %25 = vector.broadcast %24 : f32 to vector<1x2x128xf32>
    %26 = arith.subf %23, %25 : vector<1x2x128xf32>
    %c2_22 = arith.constant 2 : index
    %27 = memref.load %arg3[%c2_22] : memref<3xf32, #tpu.memory_space<smem>>
    %28 = vector.broadcast %27 : f32 to vector<1x2x128xf32>
    %29 = arith.mulf %26, %28 : vector<1x2x128xf32>
    %c0_23 = arith.constant 0 : index
    %c2_24 = arith.constant 2 : index
    %c0_25 = arith.constant 0 : index
    %c0_26 = arith.constant 0 : index
    %30 = vector.load %arg5[%c0_23, %c2_24, %c0_25, %c0_26] : memref<1x3x2x128xf32, #tpu.memory_space<vmem>>, vector<1x1x2x128xf32>
    %31 = vector.shape_cast %30 : vector<1x1x2x128xf32> to vector<1x2x128xf32>
    %32 = vector.shape_cast %29 : vector<1x2x128xf32> to vector<1x1x2x128xf32>
    tpu.vector_store %arg5[%c0_23, %c2_24, %c0_25, %c0_26], %32 {strides = array<i32>} : memref<1x3x2x128xf32, #tpu.memory_space<vmem>>, vector<1x1x2x128xf32>,
    return
  }
  func.func @transform_0(%arg0: i32, %arg1: i32, %arg2: memref<3xf32, #tpu.memory_space<smem>>, %arg3: memref<3xf32, #tpu.memory_space<smem>>) -> (i32, i32, i32, i32) {
    %c0_i32 = arith.constant 0 : i32
    %c0_i32_0 = arith.constant 0 : i32
    %c0_i32_1 = arith.constant 0 : i32
    return %arg0, %c0_i32, %arg1, %c0_i32_0 : i32, i32, i32, i32
  }
  func.func @transform_1(%arg0: i32, %arg1: i32, %arg2: memref<3xf32, #tpu.memory_space<smem>>, %arg3: memref<3xf32, #tpu.memory_space<smem>>) -> (i32, i32, i32, i32) {
    %c0_i32 = arith.constant 0 : i32
    %c0_i32_0 = arith.constant 0 : i32
    %c0_i32_1 = arith.constant 0 : i32
    return %arg0, %c0_i32, %arg1, %c0_i32_0 : i32, i32, i32, i32
  }
}

</mosaic_0001>

<bundles_post_ra>
// kernel: tpu_custom_call.1
= control target key start
LH: loop header
LB: loop body
LE: loop exit
PB: predicated region body
PF: predicated region fallthrough
CT: control target
= control target key end

     0   :  { %s735_s0 = inlined_call_operand.hbm [shape: f32[3], index: 0, kind: input, shape index: {}]   ;;  %s736_s2 = inlined_call_operand.hbm [shape: f32[2,3,2,128], index: 2, kind: input, shape index: {}]   ;;  %s737_s3 = inlined_call_operand.hbm [shape: f32[2,3,2,128], index: 3, kind: output, shape index: {}]   ;;  %s738_s1 = inlined_call_operand.vmem [shape: f32[3], index: 1, kind: input, shape index: {}]  }
   0x1   :  { %s379_s14 = scalar_lea.hbm %s735_s0, 16 }
   0x2   :  { %p380_p0 = scmp.ne.s32.totalorder %s735_s0, %s379_s14  ;;  %p383_p1 = scmp.lt.u32.totalorder %s379_s14, %s735_s0 }
   0x4   :  { %p385_p2 = pnand %p383_p1, %p380_p0 }
   0x6   :  { %388 = shalt.err (!%p385_p2)  }
   0x7   :  { %s517_s19 = smov [#allocation3]   ;;  %s10_s24 = sshll.u32 %s738_s1, 4  ;;  %s11_s24 = int_to_ptr.vmem [resolvable:$true] %s10_s24 }
   0x8   :  { %9 = dma.hbm_to_smem %s735_s0, 16, %s517_s19, [#allocation2] }
   0x9   :  { %s389_s25 = scalar_lea.vmem %s11_s24, 16  ;;  %p394_p4 = scmp.lt.s32.totalorder %s11_s24, %s11_s24 }
   0xa   :  { %p390_p3 = scmp.ne.s32.totalorder %s11_s24, %s389_s25  ;;  %p395_p5 = scmp.lt.s32.totalorder %s389_s25, %s389_s25 }
   0xc   :  { %p396_p6 = por %p395_p5, %p394_p4 }
   0xe   :  { %p397_p7 = pnand %p396_p6, %p390_p3 }
  0x10   :  { %400 = shalt.err (!%p397_p7)  }
  0x11   :  { %s518_s26 = smov [#allocation4]  }
  0x12   :  { %13 = dma.vmem_to_smem %s11_s24, 16, %s518_s26, [#allocation2] }
  0x13   :  { %483 = dma.done.wait [#allocation2], 32 }
  0x14   :  { %484 = vsyncadd [#allocation2], 4294967264 }
  0x15   :  { %15 = sfence }
  0x16   :  { %16 = vsyncpa [#allocation6], 0 }
  0x17   :  { %18 = vsyncpa [#allocation6 + $0x1], 0 }
  0x18   :  { %19 = vsyncpa [#allocation7], 0 }
  0x19   :  { %21 = vsyncpa [#allocation7 + $0x1], 0  ;;  %s560_s0 = smov 0   ;;  %s562_s1 = smov 0  }
  0x1a   :  { %s564_s27 = smov 0   ;;  %s566_s28 = smov 0  }
  0x1b   :  { %s568_s29 = smov 0   ;;  %s570_s30 = smov 0  }
  0x1c LB: > { %s290_s4 = sadd.s32 4294967295, %s515_s30   ;;  %s291_s5 = sadd.s32 4294967294, %s515_s30   ;;  %s515_s30 = sphi %s570_s30, %s27_s30   ;;  %s511_s29 = sphi %s568_s29, %s753_s29   ;;  %s507_s28 = sphi %s566_s28, %s752_s28   ;;  %s503_s27 = sphi %s564_s27, %s751_s27   ;;  %s499_s1 = sphi %s562_s1, %s750_s1   ;;  %s495_s0 = sphi %s560_s0, %s749_s0  }
  0x1d   : > { %s39_s6 = sadd.s32 1, %s511_s29  ;;  %s48_s7 = sadd.s32 1, %s503_s27 }
  0x1e   : > { %p41_p8 = scmp.ge.s32.totalorder %s39_s6, 2  ;;  %p55_p9 = scmp.ne.s32.totalorder %s503_s27, %s499_s1 }
  0x1f   : > { %p56_p10 = scmp.eq.s32.totalorder %s515_s30, 0  ;;  %p61_p11 = scmp.ne.s32.totalorder %s499_s1, %s495_s0 }
  0x20   : > { %s755_s6 = smov (%p41_p8, %s39_s6), 0  ;;  %p62_p13 = scmp.eq.s32.totalorder %s290_s4, 0 }
  0x21   : > { %p601_p12 = por %p56_p10, %p55_p9  ;;  %s43_s9 = ssub.s32 %s511_s29, %s755_s6 }
  0x22   : > { %p87_p0 = scmp.eq.s32.totalorder %s290_s4, 1  ;;  %p46_p1 = scmp.eq.s32.totalorder %s43_s9, 0 }
  0x23   : > { %p607_p2 = por %p62_p13, %p61_p11  ;;  %p93_p4 = scmp.eq.s32.totalorder %s291_s5, 1 }
  0x24   : > { %p611_p3 = por %p87_p0, %p55_p9  ;;  %p323_p7 = scmp.lt.s32.totalorder %s515_s30, 2 }
  0x25   : > { %s616_s12 = scalar_select %p46_p1, %s503_s27, %s48_s7  }
  0x26   : > { %s742_s11 = scalar_select %p611_p3, 1, 0 }
  0x27   : > { %p618_p5 = por %p93_p4, %p61_p11  ;;  %s113_s14 = sand.u32 1, %s503_s27  }
  0x28   : > { %s307_s15 = smul.u32 6, %s113_s14  ;;  %p628_p8 = pnand %p323_p7, %p601_p12 }
  0x29   : > { %s743_s13 = scalar_select %p618_p5, 1, 0 }
  0x2a   : > { %s308_s16 = smul.u32 96, %s511_s29  ;;  %s117_s21 = scalar_lea.vmem [#allocation5], %s307_s15 }
  0x2b   : > { %s125_s22 = sshll.u32 %s117_s21, 4  ;;  %s640_s23 = scalar_lea.sflag [#allocation6], %s113_s14  ;;  %s637_s22 = int_to_ptr.vmem [resolvable:$true] %s125_s22 }
  0x2c   : > { %s635_s20 = scalar_lea.hbm %s736_s2, %s308_s16  ;;  %p403_p11 = pneg %p628_p8 }
  0x2d   : > { %s401_s24 = scalar_lea.hbm %s635_s20, 96  ;;  %s406_s4 = scalar_lea.hbm %s736_s2, 192 }
  0x2e   : > { %p402_p10 = scmp.ne.s32.totalorder %s635_s20, %s401_s24  ;;  %p407_p0 = scmp.lt.u32.totalorder %s635_s20, %s736_s2 }
  0x2f   : > { %p408_p1 = scmp.lt.u32.totalorder %s406_s4, %s401_s24  ;;  %p410_p7 = scmp.lt.u32.totalorder %s401_s24, %s635_s20 }
  0x30   : > { %p404_p12 = pnand %p403_p11, %p402_p10 }
  0x31   : > { %p409_p4 = por %p408_p1, %p407_p0 }
  0x32   : > { %p405_p13 = pneg %p404_p12 }
  0x33   : > { %p411_p6 = por %p410_p7, %p409_p4 }
  0x35   : > { %p412_p9 = pnand %p411_p6, %p405_p13 }
  0x37   : > { %415 = shalt.err (!%p412_p9)
}
  0x38   : > { %s416_s8 = scalar_lea.vmem %s637_s22, 96  ;;  %s519_s9 = smov [#allocation5]  }
  0x39   : > { %p417_p10 = scmp.ne.s32.totalorder %s637_s22, %s416_s8  ;;  %s421_s14 = sshll.u32 %s519_s9, 4  ;;  %s422_s14 = int_to_ptr.vmem [resolvable:$false] %s421_s14 }
  0x3a   : > { %s423_s15 = scalar_lea.vmem %s422_s14, 192  ;;  %p424_p3 = scmp.lt.s32.totalorder %s637_s22, %s422_s14 }
  0x3b   : > { %p419_p12 = pnand %p417_p10, %p403_p11  ;;  %p425_p0 = scmp.lt.s32.totalorder %s423_s15, %s416_s8 }
  0x3d   : > { %p420_p5 = pneg %p419_p12  ;;  %p426_p1 = por %p425_p0, %p424_p3 }
  0x3f   : > { %p427_p4 = pnand %p426_p1, %p420_p5 }
  0x41   : > { %430 = shalt.err (!%p427_p4)
}
  0x42   : > { %s520_s16 = smov 32   ;;  %s521_s18 = smov 2  }
  0x43   : > { %318 = dma.hbm_to_vmem [thread:$0]  (!%p628_p8), %s635_s20, 96, %s637_s22, %s640_s23, %s520_s16, %s520_s16, %s521_s18  }
  0x44   : > { %p133_p6 = scmp.lt.s32.totalorder %s515_s30, 3  ;;  %p745_p9 = scmp.ge.s32.totalorder %s515_s30, 1 }
  0x46   : > { %p134_p11 = pnand %p745_p9, %p133_p6 }
  0x47   : > { %s672_s19 = sand.u32 (!%p134_p11), 1, %s499_s1  }
  0x48   : > { %137 = sbr.rel (%p134_p11) target bundleno = 110 (0x6e), region = 24  ;;  %s140_s24 = scalar_lea.sflag (!%p134_p11), [#allocation6], %s672_s19 }
  0x49   : > { %s309_s21 = smul.u32 (!%p134_p11), 6, %s672_s19 }
  0x4b   : > { %s143_s25 = scalar_lea.vmem (!%p134_p11), [#allocation5], %s309_s21 }
  0x4f   : > { %486 = dma.done.wait (%p607_p2), %s140_s24, 96  }
  0x50   : > { %488 = vsyncadd (%p607_p2), %s140_s24, 4294967200  ;;  %s163_s17 = sld [smem:[#allocation3]]  ;;  %s297_s22 = sld [smem:[#allocation3 + $0x1]]  ;;  %v162_v0 = vld [vmem:[%s143_s25] sm:$0x3] }
  0x51   : > { %s166_s20 = sld [smem:[#allocation4]]  ;;  %s298_s23 = sld [smem:[#allocation4 + $0x1]]  ;;  %v296_v3 = vld [vmem:[%s143_s25 + $0x2] sm:$0x3]  ;;  %v300_v6 = vld [vmem:[%s143_s25 + $0x4] sm:$0x3] }
  0x52   : > { %s301_s26 = sld [smem:[#allocation3 + $0x2]]  ;;  %s161_s5 = scalar_lea.vmem [#allocation8], %s309_s21 }
  0x53   : > { %s302_s4 = sld [smem:[#allocation4 + $0x2]]  ;;  %s205_s7 = sshll.u32 %s161_s5, 4  ;;  %s681_s7 = int_to_ptr.vmem [resolvable:$true] %s205_s7 }
  0x54   : > { %s310_s10 = smul.u32 96, %s507_s28  ;;  %s191_s28 = scalar_lea.sflag [#allocation7], %s672_s19 }
  0x55   : > { %s431_s15 = scalar_lea.vmem %s681_s7, 96  ;;  %p746_p3 = scmp.ne.s32.totalorder %s742_s11, 0 }
  0x56   : > { %v164_v1 = vstv %s163_s17  ;;  %v173_v5 = vstv %s297_s22  ;;  %s686_s14 = scalar_lea.hbm %s737_s3, %s310_s10  ;;  %p432_p2 = scmp.ne.s32.totalorder %s681_s7, %s431_s15 }
  0x57   : > { %v167_v2 = vstv %s166_s20  ;;  %v165_v4 = vsub.f32 %v162_v0, %v164_v1  ;;  %v174_v7 = vsub.f32 %v296_v3, %v173_v5  ;;  %v176_v8 = vstv %s298_s23  ;;  %s522_s16 = smov [#allocation8]  }
  0x58   : > { %v183_v10 = vstv %s301_s26  ;;  %p433_p5 = pnand %p432_p2, %p746_p3  ;;  %s435_s18 = sshll.u32 %s522_s16, 4  ;;  %s436_s18 = int_to_ptr.vmem [resolvable:$false] %s435_s18 }
  0x59   : > { %v168_v9 = vmul.f32 %v167_v2, %v165_v4  ;;  %v186_v11 = vstv %s302_s4  ;;  %v177_v12 = vmul.f32 %v176_v8, %v174_v7  ;;  %v184_v13 = vsub.f32 %v300_v6, %v183_v10  ;;  %s437_s21 = scalar_lea.vmem %s436_s18, 192  ;;  %p438_p13 = scmp.lt.s32.totalorder %s681_s7, %s436_s18 }
  0x5a   : > { %p434_p8 = pneg %p433_p5  ;;  %p439_p7 = scmp.lt.s32.totalorder %s437_s21, %s431_s15 }
  0x5b   : > { %169 = vst [vmem:[%s161_s5] sm:$0x3] %v168_v9  ;;  %299 = vst [vmem:[%s161_s5 + $0x2] sm:$0x3] %v177_v12  ;;  %v187_v14 = vmul.f32 %v186_v11, %v184_v13 }
  0x5c   : > { %p440_p10 = por %p439_p7, %p438_p13 }
  0x5d   : > { %303 = vst [vmem:[%s161_s5 + $0x4] sm:$0x3] %v187_v14 }
  0x5e   : > { %p441_p12 = pnand %p440_p10, %p434_p8 }
  0x60   : > { %444 = shalt.err (!%p441_p12)
}
  0x61   : > { %s445_s24 = scalar_lea.hbm %s686_s14, 96  ;;  %s449_s20 = scalar_lea.hbm %s737_s3, 192 }
  0x62   : > { %p446_p0 = scmp.ne.s32.totalorder %s686_s14, %s445_s24  ;;  %p450_p6 = scmp.lt.u32.totalorder %s686_s14, %s737_s3 }
  0x63   : > { %p451_p9 = scmp.lt.u32.totalorder %s449_s20, %s445_s24  ;;  %p453_p2 = scmp.lt.u32.totalorder %s445_s24, %s686_s14 }
  0x64   : > { %p447_p1 = pnand %p446_p0, %p746_p3 }
  0x65   : > { %p452_p11 = por %p451_p9, %p450_p6 }
  0x66   : > { %p448_p4 = pneg %p447_p1 }
  0x67   : > { %p454_p5 = por %p453_p2, %p452_p11 }
  0x69   : > { %p455_p8 = pnand %p454_p5, %p448_p4 }
  0x6b   : > { %458 = shalt.err (!%p455_p8)
}
  0x6c   : > { %s523_s26 = smov 32   ;;  %s524_s4 = smov 2  }
  0x6d   : > { %313 = dma.vmem_to_hbm [thread:$0]  (%p746_p3), %s681_s7, 96, %s686_s14, %s191_s28, %s523_s26, %s523_s26, %s524_s4  }
  0x6e PF: > { %s220_s5 = sand.u32 1, %s495_s0   ;;  %p747_p13 = scmp.ne.s32.totalorder %s743_s13, 0 }
  0x6f   : > { %p748_p7 = scmp.ge.s32.totalorder %s515_s30, 2  ;;  %s221_s10 = scalar_lea.sflag [#allocation7], %s220_s5 }
  0x71   : > { %p320_p10 = pnand %p748_p7, %p747_p13 }
  0x73   : > { %490 = dma.done.wait (!%p320_p10), %s221_s10, 96  }
  0x74   : > { %492 = vsyncadd (!%p320_p10), %s221_s10, 4294967200  ;;  %s27_s30 = sadd.s32 1, %s515_s30   ;;  %s749_s0 = smov %s499_s1 }
  0x75   : > { %p24_p12 = scmp.ge.s32.totalorder %s27_s30, 4   ;;  %s750_s1 = smov %s503_s27 }
  0x76   : > { %s751_s27 = smov %s616_s12  ;;  %s752_s28 = smov %s511_s29 }
  0x77   : > { %s753_s29 = smov %s755_s6  ;;  %26 = sbr.rel (!%p24_p12) target bundleno = 28 (0x1c), region = 73 }
  0x7e   :  { %226 = vsyncpa [#allocation6], 1 }
  0x7f   :  { %228 = vsyncpa [#allocation6 + $0x1], 1 }
  0x80   :  { %229 = vsyncpa [#allocation7], 1 }
  0x81   :  { %231 = vsyncpa [#allocation7 + $0x1], 1 }

</bundles_post_ra>
